<compile_context>
chip_gen: v6e
topology: v6e:2x2x1
jax: 0.10.0
libtpu: 0.0.40
codegen_flags: <defaults>
</compile_context>

<pallas_src>
import jax
import jax.numpy as jnp
from jax.experimental import pallas as pl
from jax.experimental.pallas import tpu as pltpu

LANE = 128      # TPU lane width; all feature dims are padded to multiples of this
REP_DIM = 32    # bottleneck size of the PyTorch module


def _round_up(x, m):
    return (x + m - 1) // m * m


def mts_ae_kernel(x_ref, w1_ref, wmid_ref, bhid_ref, w6_ref, b6_ref,
                  h_ref, out_ref):
    """Fused 6-layer forward for one (TB, in_pad) batch tile.

    Weights arrive pre-padded (zero rows/cols) so the padded lanes stay exactly
    zero through the whole chain; matmuls accumulate in f32, bias+ReLU run in
    f32, activations are cast back to the weight dtype between MXU passes.
    """
    cd = w1_ref.dtype                     # compute dtype for MXU inputs (f32 or bf16)

    x = x_ref[...]                        # (TB, in_pad), already in compute dtype

    # layer 1: in_pad -> 128, ReLU
    a = jnp.dot(x, w1_ref[...], preferred_element_type=jnp.float32)
    a = jnp.maximum(a + bhid_ref[0:1, :], 0.0).astype(cd)

    # layer 2: 128 -> 128 (true width 64), ReLU
    a = jnp.dot(a, wmid_ref[0], preferred_element_type=jnp.float32)
    a = jnp.maximum(a + bhid_ref[1:2, :], 0.0).astype(cd)

    # layer 3 (bottleneck, no activation): 128 -> 128 (true width 32)
    h = jnp.dot(a, wmid_ref[1], preferred_element_type=jnp.float32) + bhid_ref[2:3, :]
    h_ref[...] = h.astype(h_ref.dtype)    # lane-dense 128-wide store

    # layer 4: 128 -> 128 (true width 64), ReLU
    a = jnp.dot(h.astype(cd), wmid_ref[2], preferred_element_type=jnp.float32)
    a = jnp.maximum(a + bhid_ref[3:4, :], 0.0).astype(cd)

    # layer 5: 128 -> 128, ReLU
    a = jnp.dot(a, wmid_ref[3], preferred_element_type=jnp.float32)
    a = jnp.maximum(a + bhid_ref[4:5, :], 0.0).astype(cd)

    # layer 6: 128 -> in_pad
    out = jnp.dot(a, w6_ref[...], preferred_element_type=jnp.float32) + b6_ref[...]
    out_ref[...] = out.astype(out_ref.dtype)


def _pack_params(params, in_size, compute_dtype):
    """Zero-pad every layer to 128-lane widths and pack into 5 arrays."""
    in_pad = _round_up(max(in_size, LANE), LANE)
    (w1, b1), (w2, b2), (w3, b3), (w4, b4), (w5, b5), (w6, b6) = params

    def pad2(a, r, c):
        return jnp.pad(a, ((0, r - a.shape[0]), (0, c - a.shape[1])))

    w1p = pad2(w1, in_pad, LANE).astype(compute_dtype)
    wmid = jnp.stack([pad2(w2, LANE, LANE), pad2(w3, LANE, LANE),
                      pad2(w4, LANE, LANE), pad2(w5, LANE, LANE)]
                     ).astype(compute_dtype)                      # (4, 128, 128)
    w6p = pad2(w6, LANE, in_pad).astype(compute_dtype)
    bhid = jnp.stack([jnp.pad(b.reshape(-1), (0, LANE - b.size))
                      for b in (b1, b2, b3, b4, b5)]).astype(jnp.float32)  # (5, 128)
    b6p = pad2(b6, 1, in_pad).astype(jnp.float32)                 # (1, in_pad)
    return w1p, wmid, bhid, w6p, b6p, in_pad


def mts_autoencoder_forward(x, params, *, compute_dtype=jnp.float32, tb=128):
    """x: (B, in_size) float32. Returns (h: (B, 32), out: (B, in_size)) float32."""
    B, in_size = x.shape
    w1p, wmid, bhid, w6p, b6p, in_pad = _pack_params(params, in_size, compute_dtype)

    b_pad = _round_up(max(B, tb), tb)
    x_pad = jnp.pad(x.astype(compute_dtype),
                    ((0, b_pad - B), (0, in_pad - in_size)))

    grid = (b_pad // tb,)

    h_full, out_full = pl.pallas_call(
        mts_ae_kernel,
        grid=grid,
        out_shape=(
            jax.ShapeDtypeStruct((b_pad, LANE), jnp.float32),
            jax.ShapeDtypeStruct((b_pad, in_pad), jnp.float32),
        ),
        in_specs=[
            # streamed activations: new block per grid step (double-buffered)
            pl.BlockSpec((tb, in_pad), lambda i: (i, 0)),
            # parameters: constant index_map -> fetched once, VMEM-resident
            pl.BlockSpec((in_pad, LANE), lambda i: (0, 0)),
            pl.BlockSpec((4, LANE, LANE), lambda i: (0, 0, 0)),
            pl.BlockSpec((5, LANE), lambda i: (0, 0)),
            pl.BlockSpec((LANE, in_pad), lambda i: (0, 0)),
            pl.BlockSpec((1, in_pad), lambda i: (0, 0)),
        ],
        out_specs=(
            pl.BlockSpec((tb, LANE), lambda i: (i, 0)),
            pl.BlockSpec((tb, in_pad), lambda i: (i, 0)),
        ),
        compiler_params=pltpu.CompilerParams(
            dimension_semantics=("parallel",),
        ),
    )(x_pad, w1p, wmid, bhid, w6p, b6p)

    # strip batch + lane padding back to the module's true shapes
    return h_full[:B, :REP_DIM], out_full[:B, :in_size]


def init_params(key, in_size):
    """Deterministic synthetic init (PyTorch-Linear-like uniform fan_in bound)."""
    dims = [(in_size, 128), (128, 64), (64, REP_DIM),
            (REP_DIM, 64), (64, 128), (128, in_size)]
    params = []
    for (fin, fout) in dims:
        key, kw, kb = jax.random.split(key, 3)
        bound = 1.0 / jnp.sqrt(fin)
        w = jax.random.uniform(kw, (fin, fout), jnp.float32, -bound, bound)
        b = jax.random.uniform(kb, (1, fout), jnp.float32, -bound, bound)
        params.append((w, b))
    return params


def reference_forward(x, params):
    """Pure-JAX reference of the PyTorch forward."""
    (w1, b1), (w2, b2), (w3, b3), (w4, b4), (w5, b5), (w6, b6) = params
    a = jnp.maximum(x @ w1 + b1, 0.0)
    a = jnp.maximum(a @ w2 + b2, 0.0)
    h = a @ w3 + b3
    a = jnp.maximum(h @ w4 + b4, 0.0)
    a = jnp.maximum(a @ w5 + b5, 0.0)
    out = a @ w6 + b6
    return h, out


if __name__ == "__main__":
    key = jax.random.PRNGKey(0)
    in_size = 64

    key, kp = jax.random.split(key)
    params = init_params(kp, in_size)

    # small toy batch (module-implied shape)
    key, kx = jax.random.split(key)
    x_small = jax.random.normal(kx, (8, in_size), jnp.float32)
    h, out = mts_autoencoder_forward(x_small, params)
    jax.block_until_ready((h, out))
    h_ref, out_ref = reference_forward(x_small, params)
    assert h.shape == (8, REP_DIM) and out.shape == (8, in_size)
    assert jnp.allclose(h, h_ref, atol=1e-5, rtol=1e-5)
    assert jnp.allclose(out, out_ref, atol=1e-5, rtol=1e-5)

    # batch that is not a tile multiple: exercises the batch grid + padding path
    key, kx2 = jax.random.split(key)
    x_big = jax.random.normal(kx2, (300, in_size), jnp.float32)
    h2, out2 = mts_autoencoder_forward(x_big, params, tb=128)
    jax.block_until_ready((h2, out2))
    h2_ref, out2_ref = reference_forward(x_big, params)
    assert jnp.allclose(h2, h2_ref, atol=1e-4, rtol=1e-4)
    assert jnp.allclose(out2, out2_ref, atol=1e-4, rtol=1e-4)

    # bf16 MXU-input path (v6e/v7x bandwidth win), f32 accumulation
    h3, out3 = mts_autoencoder_forward(x_big, params, compute_dtype=jnp.bfloat16)
    jax.block_until_ready((h3, out3))
    assert jnp.allclose(h3, h2_ref, atol=1e-1, rtol=1e-1)
    assert jnp.allclose(out3, out2_ref, atol=1e-1, rtol=1e-1)

    print("KERNEL_OK")
</pallas_src>

<mosaic_0001>
module attributes {stable_mosaic.version = 11 : i64} {
  func.func @mts_ae_kernel(%arg0: i32, %arg1: memref<128x128xf32, #tpu.memory_space<vmem>>, %arg2: memref<128x128xf32, #tpu.memory_space<vmem>>, %arg3: memref<4x128x128xf32, #tpu.memory_space<vmem>>, %arg4: memref<5x128xf32, #tpu.memory_space<vmem>>, %arg5: memref<128x128xf32, #tpu.memory_space<vmem>>, %arg6: memref<1x128xf32, #tpu.memory_space<vmem>>, %arg7: memref<128x128xf32, #tpu.memory_space<vmem>>, %arg8: memref<128x128xf32, #tpu.memory_space<vmem>>) attributes {dimension_semantics = [#tpu.dimension_semantics<parallel>], iteration_bounds = array<i64: 1>, scalar_prefetch = 0 : i64, scratch_operands = 0 : i64, tpu.core_type = #tpu.core_type<tc>, window_params = [{transform_indices = @transform_0, window_bounds = array<i64: 128, 128>}, {pipeline_mode = #tpu.pipeline_mode<synchronous>, transform_indices = @transform_1, window_bounds = array<i64: 128, 128>}, {pipeline_mode = #tpu.pipeline_mode<synchronous>, transform_indices = @transform_2, window_bounds = array<i64: 4, 128, 128>}, {pipeline_mode = #tpu.pipeline_mode<synchronous>, transform_indices = @transform_3, window_bounds = array<i64: 5, 128>}, {pipeline_mode = #tpu.pipeline_mode<synchronous>, transform_indices = @transform_4, window_bounds = array<i64: 128, 128>}, {pipeline_mode = #tpu.pipeline_mode<synchronous>, transform_indices = @transform_5, window_bounds = array<i64: 1, 128>}, {transform_indices = @transform_6, window_bounds = array<i64: 128, 128>}, {transform_indices = @transform_7, window_bounds = array<i64: 128, 128>}]} {
    %c0 = arith.constant 0 : index
    %c0_0 = arith.constant 0 : index
    %0 = vector.load %arg1[%c0, %c0_0] : memref<128x128xf32, #tpu.memory_space<vmem>>, vector<128x128xf32>
    %c0_1 = arith.constant 0 : index
    %c0_2 = arith.constant 0 : index
    %1 = vector.load %arg2[%c0_1, %c0_2] : memref<128x128xf32, #tpu.memory_space<vmem>>, vector<128x128xf32>
    %cst = arith.constant dense<0.000000e+00> : vector<128x128xf32>
    %2 = tpu.matmul %0, %1, %cst {dimension_numbers = #tpu.dot_dimension_numbers<[1], [0], [0], [1], [0, 0, 1, 1], [], []>} : vector<128x128xf32>, vector<128x128xf32>, vector<128x128xf32> -> vector<128x128xf32>
    %c0_3 = arith.constant 0 : index
    %c0_4 = arith.constant 0 : index
    %3 = vector.load %arg4[%c0_3, %c0_4] : memref<5x128xf32, #tpu.memory_space<vmem>>, vector<1x128xf32>
    %4 = vector.broadcast %3 : vector<1x128xf32> to vector<128x128xf32>
    %5 = arith.addf %2, %4 : vector<128x128xf32>
    %cst_5 = arith.constant 0.000000e+00 : f32
    %6 = vector.broadcast %cst_5 : f32 to vector<128x128xf32>
    %7 = arith.maximumf %5, %6 : vector<128x128xf32>
    %c0_6 = arith.constant 0 : index
    %c0_7 = arith.constant 0 : index
    %c0_8 = arith.constant 0 : index
    %8 = vector.load %arg3[%c0_6, %c0_7, %c0_8] : memref<4x128x128xf32, #tpu.memory_space<vmem>>, vector<1x128x128xf32>
    %9 = vector.shape_cast %8 : vector<1x128x128xf32> to vector<128x128xf32>
    %cst_9 = arith.constant dense<0.000000e+00> : vector<128x128xf32>
    %10 = tpu.matmul %7, %9, %cst_9 {dimension_numbers = #tpu.dot_dimension_numbers<[1], [0], [0], [1], [0, 0, 1, 1], [], []>} : vector<128x128xf32>, vector<128x128xf32>, vector<128x128xf32> -> vector<128x128xf32>
    %c1 = arith.constant 1 : index
    %c0_10 = arith.constant 0 : index
    %11 = vector.load %arg4[%c1, %c0_10] : memref<5x128xf32, #tpu.memory_space<vmem>>, vector<1x128xf32>
    %12 = vector.broadcast %11 : vector<1x128xf32> to vector<128x128xf32>
    %13 = arith.addf %10, %12 : vector<128x128xf32>
    %cst_11 = arith.constant 0.000000e+00 : f32
    %14 = vector.broadcast %cst_11 : f32 to vector<128x128xf32>
    %15 = arith.maximumf %13, %14 : vector<128x128xf32>
    %c1_12 = arith.constant 1 : index
    %c0_13 = arith.constant 0 : index
    %c0_14 = arith.constant 0 : index
    %16 = vector.load %arg3[%c1_12, %c0_13, %c0_14] : memref<4x128x128xf32, #tpu.memory_space<vmem>>, vector<1x128x128xf32>
    %17 = vector.shape_cast %16 : vector<1x128x128xf32> to vector<128x128xf32>
    %cst_15 = arith.constant dense<0.000000e+00> : vector<128x128xf32>
    %18 = tpu.matmul %15, %17, %cst_15 {dimension_numbers = #tpu.dot_dimension_numbers<[1], [0], [0], [1], [0, 0, 1, 1], [], []>} : vector<128x128xf32>, vector<128x128xf32>, vector<128x128xf32> -> vector<128x128xf32>
    %c2 = arith.constant 2 : index
    %c0_16 = arith.constant 0 : index
    %19 = vector.load %arg4[%c2, %c0_16] : memref<5x128xf32, #tpu.memory_space<vmem>>, vector<1x128xf32>
    %20 = vector.broadcast %19 : vector<1x128xf32> to vector<128x128xf32>
    %21 = arith.addf %18, %20 : vector<128x128xf32>
    %c0_17 = arith.constant 0 : index
    %c0_18 = arith.constant 0 : index
    %22 = vector.load %arg7[%c0_17, %c0_18] : memref<128x128xf32, #tpu.memory_space<vmem>>, vector<128x128xf32>
    tpu.vector_store %arg7[%c0_17, %c0_18], %21 {strides = array<i32>} : memref<128x128xf32, #tpu.memory_space<vmem>>, vector<128x128xf32>,
    %c2_19 = arith.constant 2 : index
    %c0_20 = arith.constant 0 : index
    %c0_21 = arith.constant 0 : index
    %23 = vector.load %arg3[%c2_19, %c0_20, %c0_21] : memref<4x128x128xf32, #tpu.memory_space<vmem>>, vector<1x128x128xf32>
    %24 = vector.shape_cast %23 : vector<1x128x128xf32> to vector<128x128xf32>
    %cst_22 = arith.constant dense<0.000000e+00> : vector<128x128xf32>
    %25 = tpu.matmul %21, %24, %cst_22 {dimension_numbers = #tpu.dot_dimension_numbers<[1], [0], [0], [1], [0, 0, 1, 1], [], []>} : vector<128x128xf32>, vector<128x128xf32>, vector<128x128xf32> -> vector<128x128xf32>
    %c3 = arith.constant 3 : index
    %c0_23 = arith.constant 0 : index
    %26 = vector.load %arg4[%c3, %c0_23] : memref<5x128xf32, #tpu.memory_space<vmem>>, vector<1x128xf32>
    %27 = vector.broadcast %26 : vector<1x128xf32> to vector<128x128xf32>
    %28 = arith.addf %25, %27 : vector<128x128xf32>
    %cst_24 = arith.constant 0.000000e+00 : f32
    %29 = vector.broadcast %cst_24 : f32 to vector<128x128xf32>
    %30 = arith.maximumf %28, %29 : vector<128x128xf32>
    %c3_25 = arith.constant 3 : index
    %c0_26 = arith.constant 0 : index
    %c0_27 = arith.constant 0 : index
    %31 = vector.load %arg3[%c3_25, %c0_26, %c0_27] : memref<4x128x128xf32, #tpu.memory_space<vmem>>, vector<1x128x128xf32>
    %32 = vector.shape_cast %31 : vector<1x128x128xf32> to vector<128x128xf32>
    %cst_28 = arith.constant dense<0.000000e+00> : vector<128x128xf32>
    %33 = tpu.matmul %30, %32, %cst_28 {dimension_numbers = #tpu.dot_dimension_numbers<[1], [0], [0], [1], [0, 0, 1, 1], [], []>} : vector<128x128xf32>, vector<128x128xf32>, vector<128x128xf32> -> vector<128x128xf32>
    %c4 = arith.constant 4 : index
    %c0_29 = arith.constant 0 : index
    %34 = vector.load %arg4[%c4, %c0_29] : memref<5x128xf32, #tpu.memory_space<vmem>>, vector<1x128xf32>
    %35 = vector.broadcast %34 : vector<1x128xf32> to vector<128x128xf32>
    %36 = arith.addf %33, %35 : vector<128x128xf32>
    %cst_30 = arith.constant 0.000000e+00 : f32
    %37 = vector.broadcast %cst_30 : f32 to vector<128x128xf32>
    %38 = arith.maximumf %36, %37 : vector<128x128xf32>
    %c0_31 = arith.constant 0 : index
    %c0_32 = arith.constant 0 : index
    %39 = vector.load %arg5[%c0_31, %c0_32] : memref<128x128xf32, #tpu.memory_space<vmem>>, vector<128x128xf32>
    %cst_33 = arith.constant dense<0.000000e+00> : vector<128x128xf32>
    %40 = tpu.matmul %38, %39, %cst_33 {dimension_numbers = #tpu.dot_dimension_numbers<[1], [0], [0], [1], [0, 0, 1, 1], [], []>} : vector<128x128xf32>, vector<128x128xf32>, vector<128x128xf32> -> vector<128x128xf32>
    %c0_34 = arith.constant 0 : index
    %c0_35 = arith.constant 0 : index
    %41 = vector.load %arg6[%c0_34, %c0_35] : memref<1x128xf32, #tpu.memory_space<vmem>>, vector<1x128xf32>
    %42 = vector.broadcast %41 : vector<1x128xf32> to vector<128x128xf32>
    %43 = arith.addf %40, %42 : vector<128x128xf32>
    %c0_36 = arith.constant 0 : index
    %c0_37 = arith.constant 0 : index
    %44 = vector.load %arg8[%c0_36, %c0_37] : memref<128x128xf32, #tpu.memory_space<vmem>>, vector<128x128xf32>
    tpu.vector_store %arg8[%c0_36, %c0_37], %43 {strides = array<i32>} : memref<128x128xf32, #tpu.memory_space<vmem>>, vector<128x128xf32>,
    return
  }
  func.func @transform_0(%arg0: i32) -> (i32, i32) {
    %c0_i32 = arith.constant 0 : i32
    %c0_i32_0 = arith.constant 0 : i32
    return %arg0, %c0_i32 : i32, i32
  }
  func.func @transform_1(%arg0: i32) -> (i32, i32) {
    %c0_i32 = arith.constant 0 : i32
    %c0_i32_0 = arith.constant 0 : i32
    %c0_i32_1 = arith.constant 0 : i32
    return %c0_i32, %c0_i32_0 : i32, i32
  }
  func.func @transform_2(%arg0: i32) -> (i32, i32, i32) {
    %c0_i32 = arith.constant 0 : i32
    %c0_i32_0 = arith.constant 0 : i32
    %c0_i32_1 = arith.constant 0 : i32
    %c0_i32_2 = arith.constant 0 : i32
    return %c0_i32, %c0_i32_0, %c0_i32_1 : i32, i32, i32
  }
  func.func @transform_3(%arg0: i32) -> (i32, i32) {
    %c0_i32 = arith.constant 0 : i32
    %c0_i32_0 = arith.constant 0 : i32
    %c0_i32_1 = arith.constant 0 : i32
    return %c0_i32, %c0_i32_0 : i32, i32
  }
  func.func @transform_4(%arg0: i32) -> (i32, i32) {
    %c0_i32 = arith.constant 0 : i32
    %c0_i32_0 = arith.constant 0 : i32
    %c0_i32_1 = arith.constant 0 : i32
    return %c0_i32, %c0_i32_0 : i32, i32
  }
  func.func @transform_5(%arg0: i32) -> (i32, i32) {
    %c0_i32 = arith.constant 0 : i32
    %c0_i32_0 = arith.constant 0 : i32
    %c0_i32_1 = arith.constant 0 : i32
    return %c0_i32, %c0_i32_0 : i32, i32
  }
  func.func @transform_6(%arg0: i32) -> (i32, i32) {
    %c0_i32 = arith.constant 0 : i32
    %c0_i32_0 = arith.constant 0 : i32
    return %arg0, %c0_i32 : i32, i32
  }
  func.func @transform_7(%arg0: i32) -> (i32, i32) {
    %c0_i32 = arith.constant 0 : i32
    %c0_i32_0 = arith.constant 0 : i32
    return %arg0, %c0_i32 : i32, i32
  }
}

</mosaic_0001>

<bundles_post_ra>
// kernel: tpu_custom_call.1
= control target key start
LH: loop header
LB: loop body
LE: loop exit
PB: predicated region body
PF: predicated region fallthrough
CT: control target
= control target key end

     0   :  { %13 = vsyncpa [#allocation3], 0  ;;  %s2025_s0 = inlined_call_operand.hbm [shape: f32[128,128], index: 0, kind: input, shape index: {}]   ;;  %s2026_s1 = inlined_call_operand.hbm [shape: f32[128,128], index: 1, kind: input, shape index: {}]   ;;  %s2027_s2 = inlined_call_operand.hbm [shape: f32[4,128,128], index: 2, kind: input, shape index: {}]   ;;  %s2028_s3 = inlined_call_operand.hbm [shape: f32[5,128], index: 3, kind: input, shape index: {}]   ;;  %s2029_s4 = inlined_call_operand.hbm [shape: f32[128,128], index: 4, kind: input, shape index: {}]   ;;  %s2030_s5 = inlined_call_operand.vmem [shape: f32[1,128], index: 5, kind: input, shape index: {}]   ;;  %s2031_s6 = inlined_call_operand.hbm [shape: f32[128,128], index: 6, kind: output, shape index: {0}]   ;;  %s2032_s7 = inlined_call_operand.hbm [shape: f32[128,128], index: 7, kind: output, shape index: {1}]  }
   0x1   :  { %14 = vsyncpa [#allocation6], 0 }
   0x2   :  { %15 = vsyncpa [#allocation9], 0 }
   0x3   :  { %16 = vsyncpa [#allocation4], 0 }
   0x4   :  { %17 = vsyncpa [#allocation13], 0  ;;  %s1934_s24 = smov [#allocation5]   ;;  %s1935_s26 = smov [#allocation8]  }
   0x5   :  { %s35_s25 = sshll.u32 %s1934_s24, 4  ;;  %s60_s27 = sshll.u32 %s1935_s26, 4  ;;  %s36_s25 = int_to_ptr.vmem [resolvable:$true] %s35_s25  ;;  %s61_s27 = int_to_ptr.vmem [resolvable:$true] %s60_s27 }
   0x6   :  { %s1792_s28 = scalar_lea.vmem %s36_s25, 2048  ;;  %p1797_p1 = scmp.lt.s32.totalorder %s36_s25, %s36_s25 }
   0x7   :  { %p1793_p0 = scmp.ne.s32.totalorder %s36_s25, %s1792_s28  ;;  %p1798_p2 = scmp.lt.s32.totalorder %s1792_s28, %s1792_s28 }
   0x9   :  { %p1799_p3 = por %p1798_p2, %p1797_p1 }
   0xb   :  { %p1800_p4 = pnand %p1799_p3, %p1793_p0 }
   0xd   :  { %1803 = shalt.err (!%p1800_p4)
}
   0xe   :  { %s1936_s29 = smov 128   ;;  %s1937_s30 = smov 8  }
   0xf   :  { %41 = dma.hbm_to_vmem [thread:$0]  %s2026_s1, 2048, %s36_s25, [#allocation6], %s1936_s29, %s1936_s29, %s1937_s30  }
  0x10   :  { %s1812_s10 = scalar_lea.vmem %s61_s27, 128  ;;  %p1817_p6 = scmp.lt.s32.totalorder %s61_s27, %s61_s27 }
  0x11   :  { %p1813_p5 = scmp.ne.s32.totalorder %s61_s27, %s1812_s10  ;;  %p1818_p7 = scmp.lt.s32.totalorder %s1812_s10, %s1812_s10 }
  0x13   :  { %p1819_p8 = por %p1818_p7, %p1817_p6 }
  0x15   :  { %p1820_p9 = pnand %p1819_p8, %p1813_p5 }
  0x17   :  { %1823 = shalt.err (!%p1820_p9)
}
  0x18   :  { %63 = dma.hbm_to_vmem [thread:$0]  %s2028_s3, 128, %s61_s27, [#allocation9]  }
  0x19   :  { %s1938_s13 = smov [#allocation2]   ;;  %s1939_s15 = smov [#allocation7]  }
  0x1a   :  { %s23_s14 = sshll.u32 %s1938_s13, 4  ;;  %s47_s16 = sshll.u32 %s1939_s15, 4  ;;  %s24_s14 = int_to_ptr.vmem [resolvable:$true] %s23_s14  ;;  %s48_s16 = int_to_ptr.vmem [resolvable:$true] %s47_s16 }
  0x1b   :  { %s1832_s17 = scalar_lea.vmem %s24_s14, 2048  ;;  %p1837_p11 = scmp.lt.s32.totalorder %s24_s14, %s24_s14 }
  0x1c   :  { %p1833_p10 = scmp.ne.s32.totalorder %s24_s14, %s1832_s17  ;;  %p1838_p12 = scmp.lt.s32.totalorder %s1832_s17, %s1832_s17 }
  0x1e   :  { %p1839_p13 = por %p1838_p12, %p1837_p11 }
  0x20   :  { %p1840_p0 = pnand %p1839_p13, %p1833_p10 }
  0x22   :  { %1843 = shalt.err (!%p1840_p0)
}
  0x23   :  { %29 = dma.hbm_to_vmem [thread:$0]  %s2025_s0, 2048, %s24_s14, [#allocation3], %s1936_s29, %s1936_s29, %s1937_s30  }
  0x24   :  { %s1852_s3 = scalar_lea.vmem %s48_s16, 8192  ;;  %p1857_p2 = scmp.lt.s32.totalorder %s48_s16, %s48_s16 }
  0x25   :  { %p1853_p1 = scmp.ne.s32.totalorder %s48_s16, %s1852_s3  ;;  %p1858_p3 = scmp.lt.s32.totalorder %s1852_s3, %s1852_s3 }
  0x27   :  { %p1859_p4 = por %p1858_p3, %p1857_p2 }
  0x29   :  { %p1860_p5 = pnand %p1859_p4, %p1853_p1 }
  0x2b   :  { %1863 = shalt.err (!%p1860_p5)
}
  0x2c   :  { %53 = dma.hbm_to_vmem [thread:$0]  %s2027_s2, 8192, %s48_s16, [#allocation6], %s1936_s29, %s1936_s29, %s1937_s30  }
  0x2d   :  { %s1940_s21 = smov [#allocation10]  }
  0x2e   :  { %s69_s22 = sshll.u32 %s1940_s21, 4  ;;  %s70_s22 = int_to_ptr.vmem [resolvable:$true] %s69_s22 }
  0x2f   :  { %s1872_s23 = scalar_lea.vmem %s70_s22, 2048  ;;  %p1877_p7 = scmp.lt.s32.totalorder %s70_s22, %s70_s22 }
  0x30   :  { %p1873_p6 = scmp.ne.s32.totalorder %s70_s22, %s1872_s23  ;;  %p1878_p8 = scmp.lt.s32.totalorder %s1872_s23, %s1872_s23 }
  0x32   :  { %p1879_p9 = por %p1878_p8, %p1877_p7 }
  0x34   :  { %p1880_p10 = pnand %p1879_p9, %p1873_p6 }
  0x36   :  { %1883 = shalt.err (!%p1880_p10)
}
  0x37   :  { %75 = dma.hbm_to_vmem [thread:$0]  %s2029_s4, 2048, %s70_s22, [#allocation9], %s1936_s29, %s1936_s29, %s1937_s30  }
  0x38   :  { %1924 = dma.done.wait [#allocation3], 2048  }
  0x39   :  { %1925 = vsyncadd [#allocation3], 4294965248 }
  0x3a   :  { %1926 = dma.done.wait [#allocation6], 10240  }
  0x3b   :  { %1927 = vsyncadd [#allocation6], 4294957056 }
  0x3c   :  { %1928 = dma.done.wait [#allocation9], 2176  }
  0x3d   :  { %1929 = vsyncadd [#allocation9], 4294965120  ;;  %v124_v0 = vld [vmem:[#allocation5 + $0x78] sm:$0xff]  ;;  %v123_v1 = vld [vmem:[#allocation5 + $0x70] sm:$0xff]  ;;  %s1941_s2 = smov [#allocation11]  }
  0x3e   :  { %1439 = vmatprep.subr.mxu0 %v124_v0  ;;  %v122_v2 = vld [vmem:[#allocation5 + $0x68] sm:$0xff]  ;;  %v121_v3 = vld [vmem:[#allocation5 + $0x60] sm:$0xff]  ;;  %v120_v5 = vld [vmem:[#allocation5 + $0x58] sm:$0xff]  ;;  %s1211_s4 = sshll.u32 %s1941_s2, 4  ;;  %s1212_s4 = int_to_ptr.vmem [resolvable:$true] %s1211_s4 }
  0x3f   :  { %1440 = vmatpush3.msra.mxu0 %v124_v0  ;;  %v93_v4 = vld [vmem:[#allocation2] sm:$0xff]  ;;  %v119_v6 = vld [vmem:[#allocation5 + $0x50] sm:$0xff]  ;;  %v118_v7 = vld [vmem:[#allocation5 + $0x48] sm:$0xff]  ;;  %s1884_s25 = scalar_lea.vmem %s1212_s4, 2048  ;;  %p1889_p12 = scmp.lt.s32.totalorder %s1212_s4, %s1212_s4 }
  0x40   :  { %1441 = vmatprep.subr.mxu0 %v123_v1  ;;  %1471 = vmatprep.mubr.f32.mxu0 %v93_v4  ;;  %v306_v8 = vld [vmem:[#allocation7 + $0x78] sm:$0xff]  ;;  %v305_v9 = vld [vmem:[#allocation7 + $0x70] sm:$0xff]  ;;  %v117_v10 = vld [vmem:[#allocation5 + $0x40] sm:$0xff]  ;;  %p1885_p11 = scmp.ne.s32.totalorder %s1212_s4, %s1884_s25  ;;  %p1890_p13 = scmp.lt.s32.totalorder %s1884_s25, %s1884_s25 }
  0x41   :  { %1442 = vmatpush3.msra.mxu0 %v123_v1  ;;  %1495 = vmatprep.subr.mxu1 %v306_v8  ;;  %v304_v11 = vld [vmem:[#allocation7 + $0x68] sm:$0xff]  ;;  %v116_v12 = vld [vmem:[#allocation5 + $0x38] sm:$0xff]  ;;  %v303_v13 = vld [vmem:[#allocation7 + $0x60] sm:$0xff] }
  0x42   :  { %1443 = vmatprep.subr.mxu0 %v122_v2  ;;  %1496 = vmatpush3.msra.mxu1 %v306_v8  ;;  %v115_v14 = vld [vmem:[#allocation5 + $0x30] sm:$0xff]  ;;  %v302_v15 = vld [vmem:[#allocation7 + $0x58] sm:$0xff]  ;;  %v114_v16 = vld [vmem:[#allocation5 + $0x28] sm:$0xff]  ;;  %p1891_p0 = por %p1890_p13, %p1889_p12 }
  0x43   :  { %1444 = vmatpush3.msra.mxu0 %v122_v2  ;;  %1497 = vmatprep.subr.mxu1 %v305_v9  ;;  %v301_v17 = vld [vmem:[#allocation7 + $0x50] sm:$0xff]  ;;  %v113_v18 = vld [vmem:[#allocation5 + $0x20] sm:$0xff]  ;;  %v300_v19 = vld [vmem:[#allocation7 + $0x48] sm:$0xff] }
  0x44   :  { %1445 = vmatprep.subr.mxu0 %v121_v3  ;;  %1498 = vmatpush3.msra.mxu1 %v305_v9  ;;  %v112_v20 = vld [vmem:[#allocation5 + $0x18] sm:$0xff]  ;;  %v299_v21 = vld [vmem:[#allocation7 + $0x40] sm:$0xff]  ;;  %v111_v22 = vld [vmem:[#allocation5 + $0x10] sm:$0xff]  ;;  %p1892_p1 = pnand %p1891_p0, %p1885_p11 }
  0x45   :  { %1446 = vmatpush3.msra.mxu0 %v121_v3  ;;  %1499 = vmatprep.subr.mxu1 %v304_v11  ;;  %v298_v23 = vld [vmem:[#allocation7 + $0x38] sm:$0xff]  ;;  %v110_v24 = vld [vmem:[#allocation5 + $0x8] sm:$0xff]  ;;  %v297_v25 = vld [vmem:[#allocation7 + $0x30] sm:$0xff] }
  0x46   :  { %1447 = vmatprep.subr.mxu0 %v120_v5  ;;  %1500 = vmatpush3.msra.mxu1 %v304_v11  ;;  %v109_v26 = vld [vmem:[#allocation5] sm:$0xff]  ;;  %v296_v27 = vld [vmem:[#allocation7 + $0x28] sm:$0xff]  ;;  %v95_v30 = vld [vmem:[#allocation2 + $0x10] sm:$0xff] }
  0x47   :  { %1448 = vmatpush3.msra.mxu0 %v120_v5  ;;  %1501 = vmatprep.subr.mxu1 %v303_v13  ;;  %v94_v28 = vld [vmem:[#allocation2 + $0x8] sm:$0xff]  ;;  %v295_v29 = vld [vmem:[#allocation7 + $0x20] sm:$0xff]  ;;  %v96_v31 = vld [vmem:[#allocation2 + $0x18] sm:$0xff] }
  0x48   :  { %1449 = vmatprep.subr.mxu0 %v119_v6  ;;  %1502 = vmatpush3.msra.mxu1 %v303_v13  ;;  %v97_v32 = vld [vmem:[#allocation2 + $0x20] sm:$0xff]  ;;  %v98_v33 = vld [vmem:[#allocation2 + $0x28] sm:$0xff]  ;;  %v99_v34 = vld [vmem:[#allocation2 + $0x30] sm:$0xff] }
  0x49   :  { %1450 = vmatpush3.msra.mxu0 %v119_v6  ;;  %1503 = vmatprep.subr.mxu1 %v302_v15  ;;  %v100_v35 = vld [vmem:[#allocation2 + $0x38] sm:$0xff]  ;;  %v101_v36 = vld [vmem:[#allocation2 + $0x40] sm:$0xff]  ;;  %v102_v37 = vld [vmem:[#allocation2 + $0x48] sm:$0xff] }
  0x4a   :  { %1451 = vmatprep.subr.mxu0 %v118_v7  ;;  %1504 = vmatpush3.msra.mxu1 %v302_v15  ;;  %v103_v38 = vld [vmem:[#allocation2 + $0x50] sm:$0xff]  ;;  %v104_v39 = vld [vmem:[#allocation2 + $0x58] sm:$0xff]  ;;  %v105_v40 = vld [vmem:[#allocation2 + $0x60] sm:$0xff] }
  0x4b   :  { %1452 = vmatpush3.msra.mxu0 %v118_v7  ;;  %1505 = vmatprep.subr.mxu1 %v301_v17  ;;  %v106_v41 = vld [vmem:[#allocation2 + $0x68] sm:$0xff]  ;;  %v107_v42 = vld [vmem:[#allocation2 + $0x70] sm:$0xff]  ;;  %v108_v43 = vld [vmem:[#allocation2 + $0x78] sm:$0xff] }
  0x4c   :  { %1453 = vmatprep.subr.mxu0 %v117_v10  ;;  %1506 = vmatpush3.msra.mxu1 %v301_v17  ;;  %v294_v44 = vld [vmem:[#allocation7 + $0x18] sm:$0xff]  ;;  %v293_v45 = vld [vmem:[#allocation7 + $0x10] sm:$0xff]  ;;  %v292_v46 = vld [vmem:[#allocation7 + $0x8] sm:$0xff] }
  0x4d   :  { %1454 = vmatpush3.msra.mxu0 %v117_v10  ;;  %1507 = vmatprep.subr.mxu1 %v300_v19  ;;  %v291_v47 = vld [vmem:[#allocation7] sm:$0xff]  ;;  %v489_v48 = vld [vmem:[#allocation7 + $0xf8] sm:$0xff]  ;;  %v488_v49 = vld [vmem:[#allocation7 + $0xf0] sm:$0xff] }
  0x4e   :  { %1455 = vmatprep.subr.mxu0 %v116_v12  ;;  %1508 = vmatpush3.msra.mxu1 %v300_v19  ;;  %v487_v50 = vld [vmem:[#allocation7 + $0xe8] sm:$0xff]  ;;  %v486_v51 = vld [vmem:[#allocation7 + $0xe0] sm:$0xff]  ;;  %v485_v52 = vld [vmem:[#allocation7 + $0xd8] sm:$0xff] }
  0x4f   :  { %1456 = vmatpush3.msra.mxu0 %v116_v12  ;;  %1509 = vmatprep.subr.mxu1 %v299_v21  ;;  %v484_v53 = vld [vmem:[#allocation7 + $0xd0] sm:$0xff]  ;;  %v483_v54 = vld [vmem:[#allocation7 + $0xc8] sm:$0xff]  ;;  %v482_v55 = vld [vmem:[#allocation7 + $0xc0] sm:$0xff] }
  0x50   :  { %1457 = vmatprep.subr.mxu0 %v115_v14  ;;  %1510 = vmatpush3.msra.mxu1 %v299_v21  ;;  %v481_v56 = vld [vmem:[#allocation7 + $0xb8] sm:$0xff]  ;;  %v480_v57 = vld [vmem:[#allocation7 + $0xb0] sm:$0xff]  ;;  %v479_v58 = vld [vmem:[#allocation7 + $0xa8] sm:$0xff] }
  0x51   :  { %1458 = vmatpush3.msra.mxu0 %v115_v14  ;;  %1511 = vmatprep.subr.mxu1 %v298_v23  ;;  %v478_v59 = vld [vmem:[#allocation7 + $0xa0] sm:$0xff]  ;;  %v477_v60 = vld [vmem:[#allocation7 + $0x98] sm:$0xff] }
  0x52   :  { %1459 = vmatprep.subr.mxu0 %v114_v16  ;;  %1512 = vmatpush3.msra.mxu1 %v298_v23  ;;  %v1241_v61 = vld [vmem:[#allocation8] ss:$0 sm:$0xff] }
  0x53   :  { %1460 = vmatpush3.msra.mxu0 %v114_v16  ;;  %1513 = vmatprep.subr.mxu1 %v297_v25 }
  0x54   :  { %1461 = vmatprep.subr.mxu0 %v113_v18  ;;  %1514 = vmatpush3.msra.mxu1 %v297_v25 }
  0x55   :  { %1462 = vmatpush3.msra.mxu0 %v113_v18  ;;  %1515 = vmatprep.subr.mxu1 %v296_v27 }
  0x56   :  { %1463 = vmatprep.subr.mxu0 %v112_v20  ;;  %1516 = vmatpush3.msra.mxu1 %v296_v27 }
  0x57   :  { %1464 = vmatpush3.msra.mxu0 %v112_v20  ;;  %1517 = vmatprep.subr.mxu1 %v295_v29 }
  0x58   :  { %1465 = vmatprep.subr.mxu0 %v111_v22  ;;  %1518 = vmatpush3.msra.mxu1 %v295_v29 }
  0x59   :  { %1466 = vmatpush3.msra.mxu0 %v111_v22  ;;  %1519 = vmatprep.subr.mxu1 %v294_v44 }
  0x5a   :  { %1467 = vmatprep.subr.mxu0 %v110_v24  ;;  %1520 = vmatpush3.msra.mxu1 %v294_v44 }
  0x5b   :  { %1468 = vmatpush3.msra.mxu0 %v110_v24  ;;  %1521 = vmatprep.subr.mxu1 %v293_v45 }
  0x5c   :  { %1469 = vmatprep.subr.mxu0 %v109_v26  ;;  %1522 = vmatpush3.msra.mxu1 %v293_v45 }
  0x5d   :  { %1470 = vmatpush3.msra.mxu0 %v109_v26  ;;  %1523 = vmatprep.subr.mxu1 %v292_v46 }
  0x5e   :  { %1472 = vmatmul.mubr.f32.vlgmr.msra.gmra.mxu0 %v94_v28  ;;  %1524 = vmatpush3.msra.mxu1 %v292_v46  ;;  %v476_v46 = vld [vmem:[#allocation7 + $0x90] sm:$0xff] }
  0x5f   :  { %1474 = vmatprep.mubr.f32.mxu0 %v95_v30  ;;  %1525 = vmatprep.subr.mxu1 %v291_v47 }
  0x60   :  { %1526 = vmatpush3.msra.mxu1 %v291_v47  ;;  %1551 = vmatprep.subr.mxu0 %v489_v48  ;;  %v475_v47 = vld [vmem:[#allocation7 + $0x88] sm:$0xff] }
  0x61   :  { %1552 = vmatpush3.msra.mxu0 %v489_v48  ;;  %v474_v48 = vld [vmem:[#allocation7 + $0x80] sm:$0xff] }
  0x62   :  { %1475 = vmatmul.mubr.f32.gmra.mxu0 %v96_v31  ;;  %1553 = vmatprep.subr.mxu0 %v488_v49 }
  0x63   :  { %1477 = vmatprep.mubr.f32.mxu0 %v97_v32  ;;  %1554 = vmatpush3.msra.mxu0 %v488_v49  ;;  %v672_v49 = vld [vmem:[#allocation7 + $0x178] sm:$0xff] }
  0x64   :  { %1555 = vmatprep.subr.mxu0 %v487_v50  ;;  %1607 = vmatprep.subr.mxu1 %v672_v49 }
  0x65   :  { %1556 = vmatpush3.msra.mxu0 %v487_v50  ;;  %v671_v50 = vld [vmem:[#allocation7 + $0x170] sm:$0xff] }
  0x66   :  { %1478 = vmatmul.mubr.f32.gmra.mxu0 %v98_v33  ;;  %1557 = vmatprep.subr.mxu0 %v486_v51 }
  0x67   :  { %1480 = vmatprep.mubr.f32.mxu0 %v99_v34  ;;  %1558 = vmatpush3.msra.mxu0 %v486_v51  ;;  %v670_v51 = vld [vmem:[#allocation7 + $0x168] sm:$0xff] }
  0x68   :  { %1559 = vmatprep.subr.mxu0 %v485_v52 }
  0x69   :  { %1560 = vmatpush3.msra.mxu0 %v485_v52  ;;  %v669_v52 = vld [vmem:[#allocation7 + $0x160] sm:$0xff] }
  0x6a   :  { %1481 = vmatmul.mubr.f32.gmra.mxu0 %v100_v35  ;;  %1561 = vmatprep.subr.mxu0 %v484_v53 }
  0x6b   :  { %1483 = vmatprep.mubr.f32.mxu0 %v101_v36  ;;  %1562 = vmatpush3.msra.mxu0 %v484_v53  ;;  %v668_v53 = vld [vmem:[#allocation7 + $0x158] sm:$0xff] }
  0x6c   :  { %1563 = vmatprep.subr.mxu0 %v483_v54 }
  0x6d   :  { %1564 = vmatpush3.msra.mxu0 %v483_v54  ;;  %v667_v54 = vld [vmem:[#allocation7 + $0x150] sm:$0xff] }
  0x6e   :  { %1484 = vmatmul.mubr.f32.gmra.mxu0 %v102_v37  ;;  %1565 = vmatprep.subr.mxu0 %v482_v55 }
  0x6f   :  { %1486 = vmatprep.mubr.f32.mxu0 %v103_v38  ;;  %1566 = vmatpush3.msra.mxu0 %v482_v55  ;;  %v666_v55 = vld [vmem:[#allocation7 + $0x148] sm:$0xff] }
  0x70   :  { %1567 = vmatprep.subr.mxu0 %v481_v56 }
  0x71   :  { %1568 = vmatpush3.msra.mxu0 %v481_v56  ;;  %v665_v56 = vld [vmem:[#allocation7 + $0x140] sm:$0xff] }
  0x72   :  { %1487 = vmatmul.mubr.f32.gmra.mxu0 %v104_v39  ;;  %1569 = vmatprep.subr.mxu0 %v480_v57 }
  0x73   :  { %1489 = vmatprep.mubr.f32.mxu0 %v105_v40  ;;  %1570 = vmatpush3.msra.mxu0 %v480_v57  ;;  %v664_v57 = vld [vmem:[#allocation7 + $0x138] sm:$0xff] }
  0x74   :  { %1571 = vmatprep.subr.mxu0 %v479_v58 }
  0x75   :  { %1572 = vmatpush3.msra.mxu0 %v479_v58  ;;  %v663_v58 = vld [vmem:[#allocation7 + $0x130] sm:$0xff] }
  0x76   :  { %1490 = vmatmul.mubr.f32.gmra.mxu0 %v106_v41  ;;  %1573 = vmatprep.subr.mxu0 %v478_v59 }
  0x77   :  { %1492 = vmatprep.mubr.f32.mxu0 %v107_v42  ;;  %1574 = vmatpush3.msra.mxu0 %v478_v59  ;;  %v662_v59 = vld [vmem:[#allocation7 + $0x128] sm:$0xff] }
  0x78   :  { %1575 = vmatprep.subr.mxu0 %v477_v60 }
  0x79   :  { %1576 = vmatpush3.msra.mxu0 %v477_v60  ;;  %v661_v60 = vld [vmem:[#allocation7 + $0x120] sm:$0xff] }
  0x7a   :  { %1493 = vmatmul.mubr.f32.gmra.mxu0 %v108_v43  ;;  %1577 = vmatprep.subr.mxu0 %v476_v46 }
  0x7b   :  { %1578 = vmatpush3.msra.mxu0 %v476_v46 }
  0x7c   :  { %1579 = vmatprep.subr.mxu0 %v475_v47 }
  0x7d   :  { %1580 = vmatpush3.msra.mxu0 %v475_v47 }
  0x7e   :  { %1581 = vmatprep.subr.mxu0 %v474_v48 }
  0x7f   :  { %1582 = vmatpush3.msra.mxu0 %v474_v48  ;;  %v658_v48 = vld [vmem:[#allocation7 + $0x108] sm:$0xff] }
 0x11e   :  { %v1473_v62 = vpop.f32.mrf.mxu0 }
 0x11f   :  { %v202_v63 = vadd.f32 %v1473_v62, %v1241_v61  ;;  %v659_v62 = vld [vmem:[#allocation7 + $0x110] sm:$0xff] }
 0x120   :  { %v196_v0 = vpop.f32.mrf.mxu0 }
 0x121   :  { %v197_v1 = vadd.f32 %v1241_v61, %v196_v0  ;;  %v276_v4 = vmax.f32 %v202_v63, 0.0  ;;  %v1242_v63 = vld [vmem:[#allocation8 + $0x1] ss:$0 sm:$0xff] }
 0x122   :  { %v1476_v2 = vpop.f32.mrf.mxu0 }
 0x123   :  { %v275_v3 = vmax.f32 %v197_v1, 0.0  ;;  %v212_v5 = vadd.f32 %v1476_v2, %v1241_v61 }
 0x124   :  { %v206_v6 = vpop.f32.mrf.mxu0 }
 0x125   :  { %v207_v7 = vadd.f32 %v1241_v61, %v206_v6  ;;  %1527 = vmatprep.mubr.f32.mxu1 %v275_v3  ;;  %v278_v10 = vmax.f32 %v212_v5, 0.0 }
 0x126   :  { %v1479_v8 = vpop.f32.mrf.mxu0  ;;  %1528 = vmatmul.mubr.f32.vlgmr.msra.gmra.mxu1 %v276_v4 }
 0x127   :  { %v277_v9 = vmax.f32 %v207_v7, 0.0  ;;  %v222_v11 = vadd.f32 %v1479_v8, %v1241_v61  ;;  %1608 = vmatpush3.msra.mxu1 %v672_v49  ;;  %v657_v49 = vld [vmem:[#allocation7 + $0x100] sm:$0xff] }
 0x128   :  { %v216_v12 = vpop.f32.mrf.mxu0  ;;  %1609 = vmatprep.subr.mxu1 %v671_v50 }
 0x129   :  { %v217_v13 = vadd.f32 %v1241_v61, %v216_v12  ;;  %1530 = vmatprep.mubr.f32.mxu1 %v277_v9  ;;  %v280_v16 = vmax.f32 %v222_v11, 0.0  ;;  %1610 = vmatpush3.msra.mxu1 %v671_v50  ;;  %v855_v50 = vld [vmem:[#allocation7 + $0x1f8] sm:$0xff] }
 0x12a   :  { %v1482_v14 = vpop.f32.mrf.mxu0  ;;  %1531 = vmatmul.mubr.f32.gmra.mxu1 %v278_v10  ;;  %1611 = vmatprep.subr.mxu1 %v670_v51 }
 0x12b   :  { %v279_v15 = vmax.f32 %v217_v13, 0.0  ;;  %v232_v17 = vadd.f32 %v1482_v14, %v1241_v61  ;;  %1612 = vmatpush3.msra.mxu1 %v670_v51  ;;  %v854_v51 = vld [vmem:[#allocation7 + $0x1f0] sm:$0xff]  ;;  %1663 = vmatprep.subr.mxu0 %v855_v50 }
 0x12c   :  { %v226_v18 = vpop.f32.mrf.mxu0  ;;  %1613 = vmatprep.subr.mxu1 %v669_v52 }
 0x12d   :  { %v227_v19 = vadd.f32 %v1241_v61, %v226_v18  ;;  %1533 = vmatprep.mubr.f32.mxu1 %v279_v15  ;;  %v282_v22 = vmax.f32 %v232_v17, 0.0  ;;  %1614 = vmatpush3.msra.mxu1 %v669_v52  ;;  %v853_v52 = vld [vmem:[#allocation7 + $0x1e8] sm:$0xff] }
 0x12e   :  { %v1485_v20 = vpop.f32.mrf.mxu0  ;;  %1534 = vmatmul.mubr.f32.gmra.mxu1 %v280_v16  ;;  %1615 = vmatprep.subr.mxu1 %v668_v53 }
 0x12f   :  { %v281_v21 = vmax.f32 %v227_v19, 0.0  ;;  %v242_v23 = vadd.f32 %v1485_v20, %v1241_v61  ;;  %1616 = vmatpush3.msra.mxu1 %v668_v53  ;;  %v852_v53 = vld [vmem:[#allocation7 + $0x1e0] sm:$0xff] }
 0x130   :  { %v236_v24 = vpop.f32.mrf.mxu0  ;;  %1617 = vmatprep.subr.mxu1 %v667_v54 }
 0x131   :  { %v237_v25 = vadd.f32 %v1241_v61, %v236_v24  ;;  %1536 = vmatprep.mubr.f32.mxu1 %v281_v21  ;;  %v284_v28 = vmax.f32 %v242_v23, 0.0  ;;  %1618 = vmatpush3.msra.mxu1 %v667_v54  ;;  %v851_v54 = vld [vmem:[#allocation7 + $0x1d8] sm:$0xff] }
 0x132   :  { %v1488_v26 = vpop.f32.mrf.mxu0  ;;  %1537 = vmatmul.mubr.f32.gmra.mxu1 %v282_v22  ;;  %1619 = vmatprep.subr.mxu1 %v666_v55 }
 0x133   :  { %v283_v27 = vmax.f32 %v237_v25, 0.0  ;;  %v252_v29 = vadd.f32 %v1488_v26, %v1241_v61  ;;  %1620 = vmatpush3.msra.mxu1 %v666_v55  ;;  %v850_v55 = vld [vmem:[#allocation7 + $0x1d0] sm:$0xff] }
 0x134   :  { %v246_v30 = vpop.f32.mrf.mxu0  ;;  %1621 = vmatprep.subr.mxu1 %v665_v56 }
 0x135   :  { %v247_v31 = vadd.f32 %v1241_v61, %v246_v30  ;;  %1539 = vmatprep.mubr.f32.mxu1 %v283_v27  ;;  %v286_v34 = vmax.f32 %v252_v29, 0.0  ;;  %1622 = vmatpush3.msra.mxu1 %v665_v56  ;;  %v849_v56 = vld [vmem:[#allocation7 + $0x1c8] sm:$0xff] }
 0x136   :  { %v1491_v32 = vpop.f32.mrf.mxu0  ;;  %1540 = vmatmul.mubr.f32.gmra.mxu1 %v284_v28  ;;  %1623 = vmatprep.subr.mxu1 %v664_v57 }
 0x137   :  { %v285_v33 = vmax.f32 %v247_v31, 0.0  ;;  %v262_v35 = vadd.f32 %v1491_v32, %v1241_v61  ;;  %1624 = vmatpush3.msra.mxu1 %v664_v57  ;;  %v848_v57 = vld [vmem:[#allocation7 + $0x1c0] sm:$0xff] }
 0x138   :  { %v256_v36 = vpop.f32.mrf.mxu0  ;;  %1625 = vmatprep.subr.mxu1 %v663_v58 }
 0x139   :  { %v257_v37 = vadd.f32 %v1241_v61, %v256_v36  ;;  %1542 = vmatprep.mubr.f32.mxu1 %v285_v33  ;;  %v288_v40 = vmax.f32 %v262_v35, 0.0  ;;  %1626 = vmatpush3.msra.mxu1 %v663_v58  ;;  %v847_v58 = vld [vmem:[#allocation7 + $0x1b8] sm:$0xff] }
 0x13a   :  { %v1494_v38 = vpop.f32.mrf.mxu0  ;;  %1543 = vmatmul.mubr.f32.gmra.mxu1 %v286_v34  ;;  %1627 = vmatprep.subr.mxu1 %v662_v59 }
 0x13b   :  { %v287_v39 = vmax.f32 %v257_v37, 0.0  ;;  %v272_v41 = vadd.f32 %v1494_v38, %v1241_v61  ;;  %1628 = vmatpush3.msra.mxu1 %v662_v59  ;;  %v846_v59 = vld [vmem:[#allocation7 + $0x1b0] sm:$0xff] }
 0x13c   :  { %v266_v42 = vpop.f32.mrf.mxu0  ;;  %1629 = vmatprep.subr.mxu1 %v661_v60 }
 0x13d   :  { %v267_v43 = vadd.f32 %v1241_v61, %v266_v42  ;;  %1545 = vmatprep.mubr.f32.mxu1 %v287_v39  ;;  %v290_v45 = vmax.f32 %v272_v41, 0.0  ;;  %v660_v61 = vld [vmem:[#allocation7 + $0x118] sm:$0xff]  ;;  %1630 = vmatpush3.msra.mxu1 %v661_v60  ;;  %v845_v60 = vld [vmem:[#allocation7 + $0x1a8] sm:$0xff] }
 0x13e   :  { %1546 = vmatmul.mubr.f32.gmra.mxu1 %v288_v40  ;;  %1631 = vmatprep.subr.mxu1 %v660_v61 }
 0x13f   :  { %v289_v44 = vmax.f32 %v267_v43, 0.0  ;;  %1632 = vmatpush3.msra.mxu1 %v660_v61  ;;  %v844_v61 = vld [vmem:[#allocation7 + $0x1a0] sm:$0xff] }
 0x140   :  { %1633 = vmatprep.subr.mxu1 %v659_v62 }
 0x141   :  { %1548 = vmatprep.mubr.f32.mxu1 %v289_v44  ;;  %1634 = vmatpush3.msra.mxu1 %v659_v62  ;;  %v843_v62 = vld [vmem:[#allocation7 + $0x198] sm:$0xff] }
 0x142   :  { %1549 = vmatmul.mubr.f32.gmra.mxu1 %v290_v45  ;;  %1635 = vmatprep.subr.mxu1 %v658_v48 }
 0x143   :  { %1636 = vmatpush3.msra.mxu1 %v658_v48  ;;  %v1244_v48 = vld [vmem:[#allocation8 + $0x3] ss:$0 sm:$0xff] }
 0x144   :  { %1637 = vmatprep.subr.mxu1 %v657_v49 }
 0x145   :  { %1638 = vmatpush3.msra.mxu1 %v657_v49 }
 0x1e6   :  { %v1529_v0 = vpop.f32.mrf.mxu1 }
 0x1e7   :  { %v384_v1 = vadd.f32 %v1529_v0, %v1242_v63 }
 0x1e8   :  { %v378_v2 = vpop.f32.mrf.mxu1 }
 0x1e9   :  { %v379_v3 = vadd.f32 %v1242_v63, %v378_v2  ;;  %v458_v6 = vmax.f32 %v384_v1, 0.0 }
 0x1ea   :  { %v1532_v4 = vpop.f32.mrf.mxu1 }
 0x1eb   :  { %v457_v5 = vmax.f32 %v379_v3, 0.0  ;;  %v394_v7 = vadd.f32 %v1532_v4, %v1242_v63 }
 0x1ec   :  { %v388_v8 = vpop.f32.mrf.mxu1 }
 0x1ed   :  { %v389_v9 = vadd.f32 %v1242_v63, %v388_v8  ;;  %1583 = vmatprep.mubr.f32.mxu0 %v457_v5  ;;  %v460_v12 = vmax.f32 %v394_v7, 0.0 }
 0x1ee   :  { %v1535_v10 = vpop.f32.mrf.mxu1  ;;  %1584 = vmatmul.mubr.f32.vlgmr.msra.gmra.mxu0 %v458_v6 }
 0x1ef   :  { %v459_v11 = vmax.f32 %v389_v9, 0.0  ;;  %v404_v13 = vadd.f32 %v1535_v10, %v1242_v63  ;;  %1664 = vmatpush3.msra.mxu0 %v855_v50 }
 0x1f0   :  { %v398_v14 = vpop.f32.mrf.mxu1  ;;  %1665 = vmatprep.subr.mxu0 %v854_v51 }
 0x1f1   :  { %v399_v15 = vadd.f32 %v1242_v63, %v398_v14  ;;  %1586 = vmatprep.mubr.f32.mxu0 %v459_v11  ;;  %v462_v18 = vmax.f32 %v404_v13, 0.0  ;;  %1666 = vmatpush3.msra.mxu0 %v854_v51 }
 0x1f2   :  { %v1538_v16 = vpop.f32.mrf.mxu1  ;;  %1587 = vmatmul.mubr.f32.gmra.mxu0 %v460_v12  ;;  %1667 = vmatprep.subr.mxu0 %v853_v52 }
 0x1f3   :  { %v461_v17 = vmax.f32 %v399_v15, 0.0  ;;  %v414_v19 = vadd.f32 %v1538_v16, %v1242_v63  ;;  %1668 = vmatpush3.msra.mxu0 %v853_v52 }
 0x1f4   :  { %v408_v20 = vpop.f32.mrf.mxu1  ;;  %1669 = vmatprep.subr.mxu0 %v852_v53 }
 0x1f5   :  { %v409_v21 = vadd.f32 %v1242_v63, %v408_v20  ;;  %1589 = vmatprep.mubr.f32.mxu0 %v461_v17  ;;  %v464_v24 = vmax.f32 %v414_v19, 0.0  ;;  %1670 = vmatpush3.msra.mxu0 %v852_v53 }
 0x1f6   :  { %v1541_v22 = vpop.f32.mrf.mxu1  ;;  %1590 = vmatmul.mubr.f32.gmra.mxu0 %v462_v18  ;;  %1671 = vmatprep.subr.mxu0 %v851_v54 }
 0x1f7   :  { %v463_v23 = vmax.f32 %v409_v21, 0.0  ;;  %v424_v25 = vadd.f32 %v1541_v22, %v1242_v63  ;;  %1672 = vmatpush3.msra.mxu0 %v851_v54 }
 0x1f8   :  { %v418_v26 = vpop.f32.mrf.mxu1  ;;  %1673 = vmatprep.subr.mxu0 %v850_v55 }
 0x1f9   :  { %v419_v27 = vadd.f32 %v1242_v63, %v418_v26  ;;  %1592 = vmatprep.mubr.f32.mxu0 %v463_v23  ;;  %v466_v30 = vmax.f32 %v424_v25, 0.0  ;;  %1674 = vmatpush3.msra.mxu0 %v850_v55 }
 0x1fa   :  { %v1544_v28 = vpop.f32.mrf.mxu1  ;;  %1593 = vmatmul.mubr.f32.gmra.mxu0 %v464_v24  ;;  %1675 = vmatprep.subr.mxu0 %v849_v56 }
 0x1fb   :  { %v465_v29 = vmax.f32 %v419_v27, 0.0  ;;  %v434_v31 = vadd.f32 %v1544_v28, %v1242_v63  ;;  %1676 = vmatpush3.msra.mxu0 %v849_v56 }
 0x1fc   :  { %v428_v32 = vpop.f32.mrf.mxu1  ;;  %1677 = vmatprep.subr.mxu0 %v848_v57 }
 0x1fd   :  { %v429_v33 = vadd.f32 %v1242_v63, %v428_v32  ;;  %1595 = vmatprep.mubr.f32.mxu0 %v465_v29  ;;  %v468_v36 = vmax.f32 %v434_v31, 0.0  ;;  %1678 = vmatpush3.msra.mxu0 %v848_v57  ;;  %v842_v32 = vld [vmem:[#allocation7 + $0x190] sm:$0xff] }
 0x1fe   :  { %v1547_v34 = vpop.f32.mrf.mxu1  ;;  %1596 = vmatmul.mubr.f32.gmra.mxu0 %v466_v30  ;;  %1679 = vmatprep.subr.mxu0 %v847_v58 }
 0x1ff   :  { %v467_v35 = vmax.f32 %v429_v33, 0.0  ;;  %v444_v37 = vadd.f32 %v1547_v34, %v1242_v63  ;;  %1680 = vmatpush3.msra.mxu0 %v847_v58  ;;  %v841_v33 = vld [vmem:[#allocation7 + $0x188] sm:$0xff]  ;;  %v840_v34 = vld [vmem:[#allocation7 + $0x180] sm:$0xff] }
 0x200   :  { %v438_v38 = vpop.f32.mrf.mxu1  ;;  %1681 = vmatprep.subr.mxu0 %v846_v59 }
 0x201   :  { %v439_v39 = vadd.f32 %v1242_v63, %v438_v38  ;;  %1598 = vmatprep.mubr.f32.mxu0 %v467_v35  ;;  %v470_v42 = vmax.f32 %v444_v37, 0.0  ;;  %1682 = vmatpush3.msra.mxu0 %v846_v59  ;;  %v1037_v35 = vld [vmem:[#allocation10 + $0x78] sm:$0xff]  ;;  %v1035_v37 = vld [vmem:[#allocation10 + $0x68] sm:$0xff]  ;;  %v1034_v38 = vld [vmem:[#allocation10 + $0x60] sm:$0xff] }
 0x202   :  { %v1550_v40 = vpop.f32.mrf.mxu1  ;;  %1599 = vmatmul.mubr.f32.gmra.mxu0 %v468_v36  ;;  %1683 = vmatprep.subr.mxu0 %v845_v60  ;;  %v1036_v36 = vld [vmem:[#allocation10 + $0x70] sm:$0xff] }
 0x203   :  { %v469_v41 = vmax.f32 %v439_v39, 0.0  ;;  %v454_v43 = vadd.f32 %v1550_v40, %v1242_v63  ;;  %1684 = vmatpush3.msra.mxu0 %v845_v60  ;;  %1719 = vmatprep.subr.mxu1 %v1037_v35  ;;  %v1033_v39 = vld [vmem:[#allocation10 + $0x58] sm:$0xff]  ;;  %v1032_v40 = vld [vmem:[#allocation10 + $0x50] sm:$0xff] }
 0x204   :  { %v448_v44 = vpop.f32.mrf.mxu1  ;;  %1685 = vmatprep.subr.mxu0 %v844_v61 }
 0x205   :  { %v449_v45 = vadd.f32 %v1242_v63, %v448_v44  ;;  %1601 = vmatprep.mubr.f32.mxu0 %v469_v41  ;;  %v472_v47 = vmax.f32 %v454_v43, 0.0  ;;  %1686 = vmatpush3.msra.mxu0 %v844_v61  ;;  %v1243_v63 = vld [vmem:[#allocation8 + $0x2] ss:$0 sm:$0xff]  ;;  %v1031_v41 = vld [vmem:[#allocation10 + $0x48] sm:$0xff]  ;;  %v1028_v44 = vld [vmem:[#allocation10 + $0x30] sm:$0xff] }
 0x206   :  { %1602 = vmatmul.mubr.f32.gmra.mxu0 %v470_v42  ;;  %1687 = vmatprep.subr.mxu0 %v843_v62  ;;  %v1030_v42 = vld [vmem:[#allocation10 + $0x40] sm:$0xff]  ;;  %v1029_v43 = vld [vmem:[#allocation10 + $0x38] sm:$0xff] }
 0x207   :  { %v471_v46 = vmax.f32 %v449_v45, 0.0  ;;  %1688 = vmatpush3.msra.mxu0 %v843_v62  ;;  %v1027_v45 = vld [vmem:[#allocation10 + $0x28] sm:$0xff] }
 0x208   :  { %1689 = vmatprep.subr.mxu0 %v842_v32 }
 0x209   :  { %1604 = vmatprep.mubr.f32.mxu0 %v471_v46  ;;  %1690 = vmatpush3.msra.mxu0 %v842_v32  ;;  %v1026_v46 = vld [vmem:[#allocation10 + $0x20] sm:$0xff] }
 0x20a   :  { %1605 = vmatmul.mubr.f32.gmra.mxu0 %v472_v47  ;;  %1691 = vmatprep.subr.mxu0 %v841_v33  ;;  %v1025_v47 = vld [vmem:[#allocation10 + $0x18] sm:$0xff] }
 0x20b   :  { %1692 = vmatpush3.msra.mxu0 %v841_v33  ;;  %v1024_v33 = vld [vmem:[#allocation10 + $0x10] sm:$0xff] }
 0x20c   :  { %1693 = vmatprep.subr.mxu0 %v840_v34 }
 0x20d   :  { %1694 = vmatpush3.msra.mxu0 %v840_v34  ;;  %v1023_v34 = vld [vmem:[#allocation10 + $0x8] sm:$0xff] }
 0x2ae   :  { %v1585_v0 = vpop.f32.mrf.mxu0 }
 0x2af   :  { %v567_v1 = vadd.f32 %v1585_v0, %v1243_v63 }
 0x2b0   :  { %v561_v2 = vpop.f32.mrf.mxu0 }
 0x2b1   :  { %641 = vst [vmem:[#allocation11 + $0x8] sm:$0xff] %v567_v1  ;;  %v562_v3 = vadd.f32 %v1243_v63, %v561_v2 }
 0x2b2   :  { %v1588_v4 = vpop.f32.mrf.mxu0 }
 0x2b3   :  { %640 = vst [vmem:[#allocation11] sm:$0xff] %v562_v3  ;;  %v577_v5 = vadd.f32 %v1588_v4, %v1243_v63  ;;  %1639 = vmatprep.mubr.f32.mxu1 %v562_v3 }
 0x2b4   :  { %v571_v6 = vpop.f32.mrf.mxu0  ;;  %1640 = vmatmul.mubr.f32.vlgmr.msra.gmra.mxu1 %v567_v1 }
 0x2b5   :  { %643 = vst [vmem:[#allocation11 + $0x18] sm:$0xff] %v577_v5  ;;  %v572_v7 = vadd.f32 %v1243_v63, %v571_v6  ;;  %1720 = vmatpush3.msra.mxu1 %v1037_v35  ;;  %v1022_v35 = vld [vmem:[#allocation10] sm:$0xff] }
 0x2b6   :  { %v1591_v8 = vpop.f32.mrf.mxu0  ;;  %1721 = vmatprep.subr.mxu1 %v1036_v36 }
 0x2b7   :  { %642 = vst [vmem:[#allocation11 + $0x10] sm:$0xff] %v572_v7  ;;  %v587_v9 = vadd.f32 %v1591_v8, %v1243_v63  ;;  %1642 = vmatprep.mubr.f32.mxu1 %v572_v7  ;;  %1722 = vmatpush3.msra.mxu1 %v1036_v36  ;;  %v1245_v36 = vld [vmem:[#allocation8 + $0x4] ss:$0 sm:$0xff] }
 0x2b8   :  { %v581_v10 = vpop.f32.mrf.mxu0  ;;  %1643 = vmatmul.mubr.f32.gmra.mxu1 %v577_v5  ;;  %1723 = vmatprep.subr.mxu1 %v1035_v37 }
 0x2b9   :  { %645 = vst [vmem:[#allocation11 + $0x28] sm:$0xff] %v587_v9  ;;  %v582_v11 = vadd.f32 %v1243_v63, %v581_v10  ;;  %1724 = vmatpush3.msra.mxu1 %v1035_v37 }
 0x2ba   :  { %v1594_v12 = vpop.f32.mrf.mxu0  ;;  %1725 = vmatprep.subr.mxu1 %v1034_v38 }
 0x2bb   :  { %644 = vst [vmem:[#allocation11 + $0x20] sm:$0xff] %v582_v11  ;;  %v597_v13 = vadd.f32 %v1594_v12, %v1243_v63  ;;  %1645 = vmatprep.mubr.f32.mxu1 %v582_v11  ;;  %1726 = vmatpush3.msra.mxu1 %v1034_v38 }
 0x2bc   :  { %v591_v14 = vpop.f32.mrf.mxu0  ;;  %1646 = vmatmul.mubr.f32.gmra.mxu1 %v587_v9  ;;  %1727 = vmatprep.subr.mxu1 %v1033_v39 }
 0x2bd   :  { %647 = vst [vmem:[#allocation11 + $0x38] sm:$0xff] %v597_v13  ;;  %v592_v15 = vadd.f32 %v1243_v63, %v591_v14  ;;  %1728 = vmatpush3.msra.mxu1 %v1033_v39 }
 0x2be   :  { %v1597_v16 = vpop.f32.mrf.mxu0  ;;  %1729 = vmatprep.subr.mxu1 %v1032_v40 }
 0x2bf   :  { %646 = vst [vmem:[#allocation11 + $0x30] sm:$0xff] %v592_v15  ;;  %v607_v17 = vadd.f32 %v1597_v16, %v1243_v63  ;;  %1648 = vmatprep.mubr.f32.mxu1 %v592_v15  ;;  %1730 = vmatpush3.msra.mxu1 %v1032_v40 }
 0x2c0   :  { %v601_v18 = vpop.f32.mrf.mxu0  ;;  %1649 = vmatmul.mubr.f32.gmra.mxu1 %v597_v13  ;;  %1731 = vmatprep.subr.mxu1 %v1031_v41 }
 0x2c1   :  { %649 = vst [vmem:[#allocation11 + $0x48] sm:$0xff] %v607_v17  ;;  %v602_v19 = vadd.f32 %v1243_v63, %v601_v18  ;;  %1732 = vmatpush3.msra.mxu1 %v1031_v41 }
 0x2c2   :  { %v1600_v20 = vpop.f32.mrf.mxu0  ;;  %1733 = vmatprep.subr.mxu1 %v1030_v42 }
 0x2c3   :  { %648 = vst [vmem:[#allocation11 + $0x40] sm:$0xff] %v602_v19  ;;  %v617_v21 = vadd.f32 %v1600_v20, %v1243_v63  ;;  %1651 = vmatprep.mubr.f32.mxu1 %v602_v19  ;;  %1734 = vmatpush3.msra.mxu1 %v1030_v42 }
 0x2c4   :  { %v611_v22 = vpop.f32.mrf.mxu0  ;;  %1652 = vmatmul.mubr.f32.gmra.mxu1 %v607_v17  ;;  %1735 = vmatprep.subr.mxu1 %v1029_v43 }
 0x2c5   :  { %651 = vst [vmem:[#allocation11 + $0x58] sm:$0xff] %v617_v21  ;;  %v612_v23 = vadd.f32 %v1243_v63, %v611_v22  ;;  %1736 = vmatpush3.msra.mxu1 %v1029_v43 }
 0x2c6   :  { %v1603_v24 = vpop.f32.mrf.mxu0  ;;  %1737 = vmatprep.subr.mxu1 %v1028_v44 }
 0x2c7   :  { %650 = vst [vmem:[#allocation11 + $0x50] sm:$0xff] %v612_v23  ;;  %v627_v25 = vadd.f32 %v1603_v24, %v1243_v63  ;;  %1654 = vmatprep.mubr.f32.mxu1 %v612_v23  ;;  %1738 = vmatpush3.msra.mxu1 %v1028_v44 }
 0x2c8   :  { %v621_v26 = vpop.f32.mrf.mxu0  ;;  %1655 = vmatmul.mubr.f32.gmra.mxu1 %v617_v21  ;;  %1739 = vmatprep.subr.mxu1 %v1027_v45 }
 0x2c9   :  { %653 = vst [vmem:[#allocation11 + $0x68] sm:$0xff] %v627_v25  ;;  %v622_v27 = vadd.f32 %v1243_v63, %v621_v26  ;;  %1740 = vmatpush3.msra.mxu1 %v1027_v45 }
 0x2ca   :  { %v1606_v28 = vpop.f32.mrf.mxu0  ;;  %1741 = vmatprep.subr.mxu1 %v1026_v46 }
 0x2cb   :  { %652 = vst [vmem:[#allocation11 + $0x60] sm:$0xff] %v622_v27  ;;  %v637_v29 = vadd.f32 %v1606_v28, %v1243_v63  ;;  %1657 = vmatprep.mubr.f32.mxu1 %v622_v27  ;;  %1742 = vmatpush3.msra.mxu1 %v1026_v46 }
 0x2cc   :  { %v631_v30 = vpop.f32.mrf.mxu0  ;;  %1658 = vmatmul.mubr.f32.gmra.mxu1 %v627_v25  ;;  %1743 = vmatprep.subr.mxu1 %v1025_v47 }
 0x2cd   :  { %655 = vst [vmem:[#allocation11 + $0x78] sm:$0xff] %v637_v29  ;;  %v632_v31 = vadd.f32 %v1243_v63, %v631_v30  ;;  %1744 = vmatpush3.msra.mxu1 %v1025_v47 }
 0x2ce   :  { %1745 = vmatprep.subr.mxu1 %v1024_v33 }
 0x2cf   :  { %654 = vst [vmem:[#allocation11 + $0x70] sm:$0xff] %v632_v31  ;;  %1660 = vmatprep.mubr.f32.mxu1 %v632_v31  ;;  %1746 = vmatpush3.msra.mxu1 %v1024_v33 }
 0x2d0   :  { %1661 = vmatmul.mubr.f32.gmra.mxu1 %v637_v29  ;;  %1747 = vmatprep.subr.mxu1 %v1023_v34 }
 0x2d1   :  { %1748 = vmatpush3.msra.mxu1 %v1023_v34 }
 0x2d2   :  { %1749 = vmatprep.subr.mxu1 %v1022_v35 }
 0x2d3   :  { %1750 = vmatpush3.msra.mxu1 %v1022_v35 }
 0x374   :  { %v1641_v49 = vpop.f32.mrf.mxu1 }
 0x375   :  { %v750_v50 = vadd.f32 %v1641_v49, %v1244_v48 }
 0x376   :  { %v744_v51 = vpop.f32.mrf.mxu1 }
 0x377   :  { %v745_v52 = vadd.f32 %v1244_v48, %v744_v51  ;;  %v824_v55 = vmax.f32 %v750_v50, 0.0 }
 0x378   :  { %v1644_v53 = vpop.f32.mrf.mxu1 }
 0x379   :  { %v823_v54 = vmax.f32 %v745_v52, 0.0  ;;  %v760_v56 = vadd.f32 %v1644_v53, %v1244_v48 }
 0x37a   :  { %v754_v57 = vpop.f32.mrf.mxu1 }
 0x37b   :  { %v755_v58 = vadd.f32 %v1244_v48, %v754_v57  ;;  %1695 = vmatprep.mubr.f32.mxu0 %v823_v54  ;;  %v826_v61 = vmax.f32 %v760_v56, 0.0 }
 0x37c   :  { %v1647_v59 = vpop.f32.mrf.mxu1  ;;  %1696 = vmatmul.mubr.f32.vlgmr.msra.gmra.mxu0 %v824_v55 }
 0x37d   :  { %v825_v60 = vmax.f32 %v755_v58, 0.0  ;;  %v770_v62 = vadd.f32 %v1647_v59, %v1244_v48 }
 0x37e   :  { %v764_v63 = vpop.f32.mrf.mxu1 }
 0x37f   :  { %v765_v0 = vadd.f32 %v1244_v48, %v764_v63  ;;  %1698 = vmatprep.mubr.f32.mxu0 %v825_v60  ;;  %v828_v3 = vmax.f32 %v770_v62, 0.0 }
 0x380   :  { %v1650_v1 = vpop.f32.mrf.mxu1  ;;  %1699 = vmatmul.mubr.f32.gmra.mxu0 %v826_v61 }
 0x381   :  { %v827_v2 = vmax.f32 %v765_v0, 0.0  ;;  %v780_v4 = vadd.f32 %v1650_v1, %v1244_v48 }
 0x382   :  { %v774_v5 = vpop.f32.mrf.mxu1 }
 0x383   :  { %v775_v6 = vadd.f32 %v1244_v48, %v774_v5  ;;  %1701 = vmatprep.mubr.f32.mxu0 %v827_v2  ;;  %v830_v9 = vmax.f32 %v780_v4, 0.0 }
 0x384   :  { %v1653_v7 = vpop.f32.mrf.mxu1  ;;  %1702 = vmatmul.mubr.f32.gmra.mxu0 %v828_v3 }
 0x385   :  { %v829_v8 = vmax.f32 %v775_v6, 0.0  ;;  %v790_v10 = vadd.f32 %v1653_v7, %v1244_v48 }
 0x386   :  { %v784_v11 = vpop.f32.mrf.mxu1 }
 0x387   :  { %v785_v12 = vadd.f32 %v1244_v48, %v784_v11  ;;  %1704 = vmatprep.mubr.f32.mxu0 %v829_v8  ;;  %v832_v15 = vmax.f32 %v790_v10, 0.0 }
 0x388   :  { %v1656_v13 = vpop.f32.mrf.mxu1  ;;  %1705 = vmatmul.mubr.f32.gmra.mxu0 %v830_v9 }
 0x389   :  { %v831_v14 = vmax.f32 %v785_v12, 0.0  ;;  %v800_v16 = vadd.f32 %v1656_v13, %v1244_v48 }
 0x38a   :  { %v794_v17 = vpop.f32.mrf.mxu1 }
 0x38b   :  { %v795_v18 = vadd.f32 %v1244_v48, %v794_v17  ;;  %1707 = vmatprep.mubr.f32.mxu0 %v831_v14  ;;  %v834_v21 = vmax.f32 %v800_v16, 0.0 }
 0x38c   :  { %v1659_v19 = vpop.f32.mrf.mxu1  ;;  %1708 = vmatmul.mubr.f32.gmra.mxu0 %v832_v15 }
 0x38d   :  { %v833_v20 = vmax.f32 %v795_v18, 0.0  ;;  %v810_v22 = vadd.f32 %v1659_v19, %v1244_v48 }
 0x38e   :  { %v804_v23 = vpop.f32.mrf.mxu1 }
 0x38f   :  { %v805_v24 = vadd.f32 %v1244_v48, %v804_v23  ;;  %1710 = vmatprep.mubr.f32.mxu0 %v833_v20  ;;  %v836_v27 = vmax.f32 %v810_v22, 0.0 }
 0x390   :  { %v1662_v25 = vpop.f32.mrf.mxu1  ;;  %1711 = vmatmul.mubr.f32.gmra.mxu0 %v834_v21 }
 0x391   :  { %v835_v26 = vmax.f32 %v805_v24, 0.0  ;;  %v820_v28 = vadd.f32 %v1662_v25, %v1244_v48 }
 0x392   :  { %v814_v29 = vpop.f32.mrf.mxu1 }
 0x393   :  { %v815_v30 = vadd.f32 %v1244_v48, %v814_v29  ;;  %1713 = vmatprep.mubr.f32.mxu0 %v835_v26  ;;  %v838_v32 = vmax.f32 %v820_v28, 0.0 }
 0x394   :  { %1714 = vmatmul.mubr.f32.gmra.mxu0 %v836_v27 }
 0x395   :  { %v837_v31 = vmax.f32 %v815_v30, 0.0 }
 0x397   :  { %1716 = vmatprep.mubr.f32.mxu0 %v837_v31 }
 0x398   :  { %1717 = vmatmul.mubr.f32.gmra.mxu0 %v838_v32 }
 0x43c   :  { %v1697_v37 = vpop.f32.mrf.mxu0 }
 0x43d   :  { %v933_v38 = vadd.f32 %v1697_v37, %v1245_v36 }
 0x43e   :  { %v927_v39 = vpop.f32.mrf.mxu0 }
 0x43f   :  { %v928_v40 = vadd.f32 %v1245_v36, %v927_v39  ;;  %v1007_v43 = vmax.f32 %v933_v38, 0.0 }
 0x440   :  { %v1700_v41 = vpop.f32.mrf.mxu0 }
 0x441   :  { %v1006_v42 = vmax.f32 %v928_v40, 0.0  ;;  %v943_v44 = vadd.f32 %v1700_v41, %v1245_v36 }
 0x442   :  { %v937_v45 = vpop.f32.mrf.mxu0 }
 0x443   :  { %v938_v46 = vadd.f32 %v1245_v36, %v937_v45  ;;  %1751 = vmatprep.mubr.f32.mxu1 %v1006_v42  ;;  %v1009_v49 = vmax.f32 %v943_v44, 0.0 }
 0x444   :  { %v1703_v47 = vpop.f32.mrf.mxu0  ;;  %1752 = vmatmul.mubr.f32.vlgmr.msra.gmra.mxu1 %v1007_v43 }
 0x445   :  { %v1008_v48 = vmax.f32 %v938_v46, 0.0  ;;  %v953_v50 = vadd.f32 %v1703_v47, %v1245_v36 }
 0x446   :  { %v947_v51 = vpop.f32.mrf.mxu0 }
 0x447   :  { %v948_v52 = vadd.f32 %v1245_v36, %v947_v51  ;;  %1754 = vmatprep.mubr.f32.mxu1 %v1008_v48  ;;  %v1011_v55 = vmax.f32 %v953_v50, 0.0 }
 0x448   :  { %v1706_v53 = vpop.f32.mrf.mxu0  ;;  %1755 = vmatmul.mubr.f32.gmra.mxu1 %v1009_v49 }
 0x449   :  { %v1010_v54 = vmax.f32 %v948_v52, 0.0  ;;  %v963_v56 = vadd.f32 %v1706_v53, %v1245_v36 }
 0x44a   :  { %v957_v57 = vpop.f32.mrf.mxu0 }
 0x44b   :  { %v958_v58 = vadd.f32 %v1245_v36, %v957_v57  ;;  %1757 = vmatprep.mubr.f32.mxu1 %v1010_v54  ;;  %v1013_v61 = vmax.f32 %v963_v56, 0.0 }
 0x44c   :  { %v1709_v59 = vpop.f32.mrf.mxu0  ;;  %1758 = vmatmul.mubr.f32.gmra.mxu1 %v1011_v55 }
 0x44d   :  { %v1012_v60 = vmax.f32 %v958_v58, 0.0  ;;  %v973_v62 = vadd.f32 %v1709_v59, %v1245_v36 }
 0x44e   :  { %v967_v63 = vpop.f32.mrf.mxu0 }
 0x44f   :  { %v968_v0 = vadd.f32 %v1245_v36, %v967_v63  ;;  %1760 = vmatprep.mubr.f32.mxu1 %v1012_v60  ;;  %v1015_v3 = vmax.f32 %v973_v62, 0.0 }
 0x450   :  { %v1712_v1 = vpop.f32.mrf.mxu0  ;;  %1761 = vmatmul.mubr.f32.gmra.mxu1 %v1013_v61 }
 0x451   :  { %v1014_v2 = vmax.f32 %v968_v0, 0.0  ;;  %v983_v4 = vadd.f32 %v1712_v1, %v1245_v36 }
 0x452   :  { %v977_v5 = vpop.f32.mrf.mxu0 }
 0x453   :  { %v978_v6 = vadd.f32 %v1245_v36, %v977_v5  ;;  %1763 = vmatprep.mubr.f32.mxu1 %v1014_v2  ;;  %v1017_v9 = vmax.f32 %v983_v4, 0.0 }
 0x454   :  { %v1715_v7 = vpop.f32.mrf.mxu0  ;;  %1764 = vmatmul.mubr.f32.gmra.mxu1 %v1015_v3 }
 0x455   :  { %v1016_v8 = vmax.f32 %v978_v6, 0.0  ;;  %v993_v10 = vadd.f32 %v1715_v7, %v1245_v36 }
 0x456   :  { %v987_v11 = vpop.f32.mrf.mxu0 }
 0x457   :  { %v988_v12 = vadd.f32 %v1245_v36, %v987_v11  ;;  %1766 = vmatprep.mubr.f32.mxu1 %v1016_v8  ;;  %v1019_v15 = vmax.f32 %v993_v10, 0.0 }
 0x458   :  { %v1718_v13 = vpop.f32.mrf.mxu0  ;;  %1767 = vmatmul.mubr.f32.gmra.mxu1 %v1017_v9 }
 0x459   :  { %v1018_v14 = vmax.f32 %v988_v12, 0.0  ;;  %v1003_v16 = vadd.f32 %v1718_v13, %v1245_v36 }
 0x45a   :  { %v997_v17 = vpop.f32.mrf.mxu0 }
 0x45b   :  { %v998_v18 = vadd.f32 %v1245_v36, %v997_v17  ;;  %1769 = vmatprep.mubr.f32.mxu1 %v1018_v14  ;;  %v1021_v20 = vmax.f32 %v1003_v16, 0.0 }
 0x45c   :  { %1770 = vmatmul.mubr.f32.gmra.mxu1 %v1019_v15 }
 0x45d   :  { %v1020_v19 = vmax.f32 %v998_v18, 0.0 }
 0x45f   :  { %1772 = vmatprep.mubr.f32.mxu1 %v1020_v19 }
 0x460   :  { %1773 = vmatmul.mubr.f32.gmra.mxu1 %v1021_v20 }
 0x461   :  { %1895 = shalt.err (!%p1892_p1)
}
 0x462   :  { %1217 = dma.vmem_to_hbm [thread:$0]  %s1212_s4, 2048, %s2031_s6, [#allocation4], %s1936_s29, %s1936_s29, %s1937_s30  }
 0x463   :  { %v1246_v21 = vld [vmem:[%s2030_s5] ss:$0 sm:$0xff]  ;;  %s1942_s5 = smov [#allocation12]  }
 0x464   :  { %s1223_s6 = sshll.u32 %s1942_s5, 4  ;;  %s1224_s6 = int_to_ptr.vmem [resolvable:$true] %s1223_s6 }
 0x465   :  { %s1904_s9 = scalar_lea.vmem %s1224_s6, 2048  ;;  %p1909_p3 = scmp.lt.s32.totalorder %s1224_s6, %s1224_s6 }
 0x466   :  { %p1905_p2 = scmp.ne.s32.totalorder %s1224_s6, %s1904_s9  ;;  %p1910_p4 = scmp.lt.s32.totalorder %s1904_s9, %s1904_s9 }
 0x468   :  { %p1911_p5 = por %p1910_p4, %p1909_p3 }
 0x46a   :  { %p1912_p6 = pnand %p1911_p5, %p1905_p2 }
 0x504   :  { %v1753_v22 = vpop.f32.mrf.mxu1 }
 0x505   :  { %v1117_v23 = vadd.f32 %v1753_v22, %v1246_v21 }
 0x506   :  { %v1111_v24 = vpop.f32.mrf.mxu1 }
 0x507   :  { %1191 = vst [vmem:[#allocation12 + $0x8] sm:$0xff] %v1117_v23  ;;  %v1112_v25 = vadd.f32 %v1246_v21, %v1111_v24 }
 0x508   :  { %v1756_v26 = vpop.f32.mrf.mxu1 }
 0x509   :  { %1190 = vst [vmem:[#allocation12] sm:$0xff] %v1112_v25  ;;  %v1127_v27 = vadd.f32 %v1756_v26, %v1246_v21 }
 0x50a   :  { %v1121_v28 = vpop.f32.mrf.mxu1 }
 0x50b   :  { %1193 = vst [vmem:[#allocation12 + $0x18] sm:$0xff] %v1127_v27  ;;  %v1122_v29 = vadd.f32 %v1246_v21, %v1121_v28 }
 0x50c   :  { %v1759_v30 = vpop.f32.mrf.mxu1 }
 0x50d   :  { %1192 = vst [vmem:[#allocation12 + $0x10] sm:$0xff] %v1122_v29  ;;  %v1137_v31 = vadd.f32 %v1759_v30, %v1246_v21 }
 0x50e   :  { %v1131_v32 = vpop.f32.mrf.mxu1 }
 0x50f   :  { %1195 = vst [vmem:[#allocation12 + $0x28] sm:$0xff] %v1137_v31  ;;  %v1132_v33 = vadd.f32 %v1246_v21, %v1131_v32 }
 0x510   :  { %v1762_v34 = vpop.f32.mrf.mxu1 }
 0x511   :  { %1194 = vst [vmem:[#allocation12 + $0x20] sm:$0xff] %v1132_v33  ;;  %v1147_v35 = vadd.f32 %v1762_v34, %v1246_v21 }
 0x512   :  { %v1141_v36 = vpop.f32.mrf.mxu1 }
 0x513   :  { %1197 = vst [vmem:[#allocation12 + $0x38] sm:$0xff] %v1147_v35  ;;  %v1142_v37 = vadd.f32 %v1246_v21, %v1141_v36 }
 0x514   :  { %v1765_v38 = vpop.f32.mrf.mxu1 }
 0x515   :  { %1196 = vst [vmem:[#allocation12 + $0x30] sm:$0xff] %v1142_v37  ;;  %v1157_v39 = vadd.f32 %v1765_v38, %v1246_v21 }
 0x516   :  { %v1151_v40 = vpop.f32.mrf.mxu1 }
 0x517   :  { %1199 = vst [vmem:[#allocation12 + $0x48] sm:$0xff] %v1157_v39  ;;  %v1152_v41 = vadd.f32 %v1246_v21, %v1151_v40 }
 0x518   :  { %v1768_v42 = vpop.f32.mrf.mxu1 }
 0x519   :  { %1198 = vst [vmem:[#allocation12 + $0x40] sm:$0xff] %v1152_v41  ;;  %v1167_v43 = vadd.f32 %v1768_v42, %v1246_v21 }
 0x51a   :  { %v1161_v44 = vpop.f32.mrf.mxu1 }
 0x51b   :  { %1201 = vst [vmem:[#allocation12 + $0x58] sm:$0xff] %v1167_v43  ;;  %v1162_v45 = vadd.f32 %v1246_v21, %v1161_v44 }
 0x51c   :  { %v1771_v46 = vpop.f32.mrf.mxu1 }
 0x51d   :  { %1200 = vst [vmem:[#allocation12 + $0x50] sm:$0xff] %v1162_v45  ;;  %v1177_v47 = vadd.f32 %v1771_v46, %v1246_v21 }
 0x51e   :  { %v1171_v48 = vpop.f32.mrf.mxu1 }
 0x51f   :  { %1203 = vst [vmem:[#allocation12 + $0x68] sm:$0xff] %v1177_v47  ;;  %v1172_v49 = vadd.f32 %v1246_v21, %v1171_v48 }
 0x520   :  { %v1774_v50 = vpop.f32.mrf.mxu1 }
 0x521   :  { %1202 = vst [vmem:[#allocation12 + $0x60] sm:$0xff] %v1172_v49  ;;  %v1187_v51 = vadd.f32 %v1774_v50, %v1246_v21 }
 0x522   :  { %v1181_v52 = vpop.f32.mrf.mxu1 }
 0x523   :  { %1205 = vst [vmem:[#allocation12 + $0x78] sm:$0xff] %v1187_v51  ;;  %v1182_v53 = vadd.f32 %v1246_v21, %v1181_v52 }
 0x525   :  { %1204 = vst [vmem:[#allocation12 + $0x70] sm:$0xff] %v1182_v53 }
 0x526   :  { %1915 = shalt.err (!%p1912_p6)
}
 0x527   :  { %1229 = dma.vmem_to_hbm [thread:$0]  %s1224_s6, 2048, %s2032_s7, [#allocation13], %s1936_s29, %s1936_s29, %s1937_s30  }
 0x528   :  { %1930 = dma.done.wait [#allocation4], 2048  }
 0x529   :  { %1931 = vsyncadd [#allocation4], 4294965248 }
 0x52a   :  { %1932 = dma.done.wait [#allocation13], 2048  }
 0x52b   :  { %1933 = vsyncadd [#allocation13], 4294965248 }
 0x52c   :  { %1236 = vsyncpa [#allocation3], 1 }
 0x52d   :  { %1237 = vsyncpa [#allocation6], 1 }
 0x52e   :  { %1238 = vsyncpa [#allocation9], 1 }
 0x52f   :  { %1239 = vsyncpa [#allocation4], 1 }
 0x530   :  { %1240 = vsyncpa [#allocation13], 1 }

</bundles_post_ra>
